<compile_context>
chip_gen: v5e
topology: v5e:2x2
jax: 0.10.0
libtpu: 0.0.40
codegen_flags: <defaults>
</compile_context>

<pallas_src>
import functools

import jax
import jax.numpy as jnp
from jax.experimental import pallas as pl
from jax.experimental.pallas import tpu as pltpu


def _crosstalk_attn_kernel(c1_ref, c2_ref, wqkv_ref, bqkv_ref, wo_ref, bo_ref,
                           w12_ref, b12_ref, out_ref, *, num_heads, scale,
                           matmul_dtype):
    md = matmul_dtype
    bt, s1, e = c1_ref.shape
    s2 = c2_ref.shape[1]
    t = s1 + s2
    d = e // num_heads
    rows = bt * t

    def mm(a, b):
        # MXU matmul with f32 accumulation; operands optionally cast to bf16.
        return jnp.dot(a.astype(md), b.astype(md),
                       preferred_element_type=jnp.float32)

    # Assemble the concatenated sequence tile in VMEM (no HBM materialization).
    h = jnp.concatenate([c1_ref[...], c2_ref[...]], axis=1)        # (bt, t, e)
    h2 = h.reshape(rows, e).astype(jnp.float32)

    # Fused QKV projection: one (rows, E) @ (E, 3E) matmul instead of three.
    qkv = mm(h2, wqkv_ref[...]) + bqkv_ref[...]                    # (rows, 3e)
    q = qkv[:, :e] * scale                         # PyTorch scales q by 1/sqrt(D)
    k = qkv[:, e:2 * e]
    v = qkv[:, 2 * e:]

    # Per-head attention, batched over the bt batch elements in this block.
    # (A merged (bt*H) batch einsum would need a 4-D transpose/relayout; the
    #  per-head static loop keeps only the small (rows, D) context live.)
    ctx_parts = []
    for hd in range(num_heads):
        sl = slice(hd * d, (hd + 1) * d)
        qh = q[:, sl].reshape(bt, t, d)
        kh = k[:, sl].reshape(bt, t, d)
        vh = v[:, sl].reshape(bt, t, d)
        s = jnp.einsum("bqd,bkd->bqk", qh.astype(md), kh.astype(md),
                       preferred_element_type=jnp.float32)         # (bt, t, t)
        s = s - jnp.max(s, axis=-1, keepdims=True)                 # stable softmax
        p = jnp.exp(s)
        p = p * pl.reciprocal(jnp.sum(p, axis=-1, keepdims=True), approx=False)
        ah = jnp.einsum("bqk,bkd->bqd", p.astype(md), vh.astype(md),
                        preferred_element_type=jnp.float32)        # (bt, t, d)
        ctx_parts.append(ah.reshape(rows, d))
    ctx = jnp.concatenate(ctx_parts, axis=-1)                      # (rows, e)

    # Output projection: a single K=E matmul (heads already merged on lanes).
    attn = mm(ctx, wo_ref[...]) + bo_ref[...]                      # (rows, e)
    # Fused dense1 || dense2 head -> lane-dense (rows, E) output.
    out = mm(attn, w12_ref[...]) + b12_ref[...]                    # (rows, e)
    out_ref[...] = out.reshape(bt, t, e).astype(out_ref.dtype)


def _pick_batch_tile(batch, t, target_rows=256):
    """Batch elements per grid step: make Bt*T ~ MXU rows, but keep >= 2 grid
    blocks when the batch allows (v7x has 2 TensorCores per chip)."""
    divisors = [d for d in range(1, batch + 1) if batch % d == 0]
    want = max(1, -(-target_rows // t))                 # ceil(target_rows / T)
    cands = [d for d in divisors if d >= want]
    bt = cands[0] if cands else divisors[-1]
    while bt > 1 and batch // bt < 2:
        bt = max(d for d in divisors if d < bt)
    return bt


def _vmem_limit_bytes(bt, s1, s2, t, e, itemsize=4):
    """Derive the scoped-VMEM request from actual need (cap: 64 MiB, v7x TC)."""
    tiles = 2 * bt * ((s1 + s2) * e + t * e) * itemsize      # double-buffered I/O
    weights = 2 * (5 * e * e + 5 * e) * itemsize             # resident weights/biases
    live = bt * t * (9 * e + 2 * t) * itemsize               # qkv/q/k/v/ctx/attn/out + scores
    return int(min(tiles + weights + live + (8 << 20), 64 << 20))


def crosstalk_self_attention(cross1, cross2, params, *, num_heads,
                             matmul_dtype=jnp.float32, batch_tile=None,
                             vmem_limit_bytes=None):
    """cross1, cross2: (B, S, E).  Weights stored as (in, out) = PyTorch
    nn.Linear weight transposed; biases are 1-D."""
    b, s1, e = cross1.shape
    b2, s2, e_chk = cross2.shape
    assert b == b2 and e == e_chk, "cross1/cross2 batch/embed mismatch"
    t = s1 + s2
    eh = e // 2
    assert e % num_heads == 0, "embed_dim must be divisible by num_atn_heads"
    # torch reshape_as requires (S1+S2)*(E//2) == S*E  =>  S1 == S2.
    assert t * eh == s1 * e and t * eh == s2 * e, "reshape_as requires S1 == S2"

    if batch_tile is None:
        batch_tile = _pick_batch_tile(b, t)
    assert b % batch_tile == 0, "batch_tile must divide batch"
    grid = (b // batch_tile,)
    if vmem_limit_bytes is None:
        vmem_limit_bytes = _vmem_limit_bytes(batch_tile, s1, s2, t, e)

    # Fuse weights once at trace time (tiny concats, hoisted/constant-folded).
    wqkv = jnp.concatenate([params["wq"], params["wk"], params["wv"]], axis=1)
    bqkv = jnp.concatenate([params["bq"], params["bk"], params["bv"]]).reshape(1, -1)
    w12 = jnp.concatenate([params["w1"], params["w2"]], axis=1)
    b12 = jnp.concatenate([params["b1"], params["b2"]]).reshape(1, -1)
    bo = params["bo"].reshape(1, -1)

    kernel = functools.partial(
        _crosstalk_attn_kernel,
        num_heads=num_heads,
        scale=1.0 / float(e // num_heads) ** 0.5,
        matmul_dtype=matmul_dtype)

    c1_spec = pl.BlockSpec((batch_tile, s1, e), lambda i: (i, 0, 0))
    c2_spec = pl.BlockSpec((batch_tile, s2, e), lambda i: (i, 0, 0))
    out_spec = pl.BlockSpec((batch_tile, t, e), lambda i: (i, 0, 0))

    def const(shape):  # constant block index -> stays resident across grid steps
        return pl.BlockSpec(shape, lambda i: (0,) * len(shape))

    out = pl.pallas_call(
        kernel,
        out_shape=jax.ShapeDtypeStruct((b, t, e), cross1.dtype),
        grid_spec=pltpu.PrefetchScalarGridSpec(
            num_scalar_prefetch=0,
            grid=grid,
            in_specs=[c1_spec, c2_spec,
                      const((e, 3 * e)), const((1, 3 * e)),   # Wqkv, bqkv
                      const((e, e)), const((1, e)),           # Wo, bo
                      const((e, e)), const((1, e))],          # W1||W2, b1||b2
            out_specs=out_spec),
        compiler_params=pltpu.CompilerParams(
            dimension_semantics=("parallel",),
            vmem_limit_bytes=vmem_limit_bytes),
    )(cross1, cross2, wqkv, bqkv, params["wo"], bo, w12, b12)

    # Split the fused head and apply torch's reshape_as semantics:
    # (B, 2S, E//2) -> (B, S, E) row-major.
    out1 = out[:, :, :eh].reshape(cross1.shape)
    out2 = out[:, :, eh:].reshape(cross2.shape)
    return out1, out2


def _reference(cross1, cross2, params, *, num_heads):
    h = jnp.concatenate([cross1, cross2], axis=1)
    b, t, e = h.shape
    d = e // num_heads
    q = h @ params["wq"] + params["bq"]
    k = h @ params["wk"] + params["bk"]
    v = h @ params["wv"] + params["bv"]
    q = q.reshape(b, t, num_heads, d) * (1.0 / jnp.sqrt(jnp.float32(d)))
    k = k.reshape(b, t, num_heads, d)
    v = v.reshape(b, t, num_heads, d)
    s = jnp.einsum("bqhd,bkhd->bhqk", q, k)
    p = jax.nn.softmax(s, axis=-1)
    a = jnp.einsum("bhqk,bkhd->bqhd", p, v).reshape(b, t, e)
    a = a @ params["wo"] + params["bo"]
    o1 = a @ params["w1"] + params["b1"]
    o2 = a @ params["w2"] + params["b2"]
    return o1.reshape(cross1.shape), o2.reshape(cross2.shape)


if __name__ == "__main__":
    B, S, E, H = 2, 8, 32, 4          # batch=2, seq=8 per stream, embed=32, 4 heads
    key = jax.random.PRNGKey(0)
    keys = jax.random.split(key, 16)

    cross1 = jax.random.normal(keys[0], (B, S, E), jnp.float32)
    cross2 = jax.random.normal(keys[1], (B, S, E), jnp.float32)

    def w(k, shape, fan_in):
        return jax.random.normal(k, shape, jnp.float32) * (1.0 / jnp.sqrt(fan_in))

    def bvec(k, n):
        return jax.random.normal(k, (n,), jnp.float32) * 0.01

    # Weights stored as (in, out) = transpose of PyTorch's nn.Linear (out, in).
    params = dict(
        wq=w(keys[2], (E, E), E),       bq=bvec(keys[3], E),
        wk=w(keys[4], (E, E), E),       bk=bvec(keys[5], E),
        wv=w(keys[6], (E, E), E),       bv=bvec(keys[7], E),
        wo=w(keys[8], (E, E), E),       bo=bvec(keys[9], E),
        w1=w(keys[10], (E, E // 2), E), b1=bvec(keys[11], E // 2),
        w2=w(keys[12], (E, E // 2), E), b2=bvec(keys[13], E // 2),
    )

    fn = jax.jit(functools.partial(crosstalk_self_attention, num_heads=H))
    out1, out2 = fn(cross1, cross2, params)
    jax.block_until_ready((out1, out2))

    ref1, ref2 = _reference(cross1, cross2, params, num_heads=H)
    assert out1.shape == cross1.shape and out2.shape == cross2.shape
    err1 = float(jnp.max(jnp.abs(out1 - ref1)))
    err2 = float(jnp.max(jnp.abs(out2 - ref2)))
    assert jnp.allclose(out1, ref1, atol=1e-4, rtol=1e-4), err1
    assert jnp.allclose(out2, ref2, atol=1e-4, rtol=1e-4), err2

    print("KERNEL_OK")
</pallas_src>

<mosaic_0001>
module attributes {stable_mosaic.version = 11 : i64} {
  func.func @_crosstalk_attn_kernel(%arg0: i32, %arg1: memref<1x8x32xf32, #tpu.memory_space<vmem>>, %arg2: memref<1x8x32xf32, #tpu.memory_space<vmem>>, %arg3: memref<32x96xf32, #tpu.memory_space<vmem>>, %arg4: memref<1x96xf32, #tpu.memory_space<vmem>>, %arg5: memref<32x32xf32, #tpu.memory_space<vmem>>, %arg6: memref<1x32xf32, #tpu.memory_space<vmem>>, %arg7: memref<32x32xf32, #tpu.memory_space<vmem>>, %arg8: memref<1x32xf32, #tpu.memory_space<vmem>>, %arg9: memref<1x16x32xf32, #tpu.memory_space<vmem>>) attributes {dimension_semantics = [#tpu.dimension_semantics<parallel>], iteration_bounds = array<i64: 2>, scalar_prefetch = 0 : i64, scratch_operands = 0 : i64, tpu.core_type = #tpu.core_type<tc>, window_params = [{transform_indices = @transform_0, window_bounds = array<i64: 1, 8, 32>}, {transform_indices = @transform_1, window_bounds = array<i64: 1, 8, 32>}, {pipeline_mode = #tpu.pipeline_mode<synchronous>, transform_indices = @transform_2, window_bounds = array<i64: 32, 96>}, {pipeline_mode = #tpu.pipeline_mode<synchronous>, transform_indices = @transform_3, window_bounds = array<i64: 1, 96>}, {pipeline_mode = #tpu.pipeline_mode<synchronous>, transform_indices = @transform_4, window_bounds = array<i64: 32, 32>}, {pipeline_mode = #tpu.pipeline_mode<synchronous>, transform_indices = @transform_5, window_bounds = array<i64: 1, 32>}, {pipeline_mode = #tpu.pipeline_mode<synchronous>, transform_indices = @transform_6, window_bounds = array<i64: 32, 32>}, {pipeline_mode = #tpu.pipeline_mode<synchronous>, transform_indices = @transform_7, window_bounds = array<i64: 1, 32>}, {transform_indices = @transform_8, window_bounds = array<i64: 1, 16, 32>}]} {
    %c0 = arith.constant 0 : index
    %c0_0 = arith.constant 0 : index
    %c0_1 = arith.constant 0 : index
    %0 = vector.load %arg1[%c0, %c0_0, %c0_1] : memref<1x8x32xf32, #tpu.memory_space<vmem>>, vector<1x8x32xf32>
    %c0_2 = arith.constant 0 : index
    %c0_3 = arith.constant 0 : index
    %c0_4 = arith.constant 0 : index
    %1 = vector.load %arg2[%c0_2, %c0_3, %c0_4] : memref<1x8x32xf32, #tpu.memory_space<vmem>>, vector<1x8x32xf32>
    %2 = tpu.concatenate %0, %1 in 1 : vector<1x8x32xf32>, vector<1x8x32xf32> -> vector<1x16x32xf32>
    %3 = vector.shape_cast %2 : vector<1x16x32xf32> to vector<16x32xf32>
    %c0_5 = arith.constant 0 : index
    %c0_6 = arith.constant 0 : index
    %4 = vector.load %arg3[%c0_5, %c0_6] : memref<32x96xf32, #tpu.memory_space<vmem>>, vector<32x96xf32>
    %cst = arith.constant dense<0.000000e+00> : vector<16x96xf32>
    %5 = tpu.matmul %3, %4, %cst {dimension_numbers = #tpu.dot_dimension_numbers<[1], [0], [0], [1], [0, 0, 1, 1], [], []>} : vector<16x32xf32>, vector<32x96xf32>, vector<16x96xf32> -> vector<16x96xf32>
    %c0_7 = arith.constant 0 : index
    %c0_8 = arith.constant 0 : index
    %6 = vector.load %arg4[%c0_7, %c0_8] : memref<1x96xf32, #tpu.memory_space<vmem>>, vector<1x96xf32>
    %7 = vector.broadcast %6 : vector<1x96xf32> to vector<16x96xf32>
    %8 = arith.addf %5, %7 : vector<16x96xf32>
    %9 = vector.extract_strided_slice %8 {offsets = [0, 0], sizes = [16, 32], strides = [1, 1]} : vector<16x96xf32> to vector<16x32xf32>
    %cst_9 = arith.constant 0.353553385 : f32
    %10 = vector.broadcast %cst_9 : f32 to vector<16x32xf32>
    %11 = arith.mulf %9, %10 : vector<16x32xf32>
    %12 = vector.extract_strided_slice %8 {offsets = [0, 32], sizes = [16, 32], strides = [1, 1]} : vector<16x96xf32> to vector<16x32xf32>
    %13 = vector.extract_strided_slice %8 {offsets = [0, 64], sizes = [16, 32], strides = [1, 1]} : vector<16x96xf32> to vector<16x32xf32>
    %14 = vector.extract_strided_slice %11 {offsets = [0, 0], sizes = [16, 8], strides = [1, 1]} : vector<16x32xf32> to vector<16x8xf32>
    %15 = vector.shape_cast %14 : vector<16x8xf32> to vector<1x16x8xf32>
    %16 = vector.extract_strided_slice %12 {offsets = [0, 0], sizes = [16, 8], strides = [1, 1]} : vector<16x32xf32> to vector<16x8xf32>
    %17 = vector.shape_cast %16 : vector<16x8xf32> to vector<1x16x8xf32>
    %18 = vector.extract_strided_slice %13 {offsets = [0, 0], sizes = [16, 8], strides = [1, 1]} : vector<16x32xf32> to vector<16x8xf32>
    %19 = vector.shape_cast %18 : vector<16x8xf32> to vector<1x16x8xf32>
    "tpu.trace_start"() <{level = 10 : i32, message = "bqd,bkd->bqk"}> : () -> ()
    %cst_10 = arith.constant dense<0.000000e+00> : vector<1x16x16xf32>
    %20 = tpu.matmul %15, %17, %cst_10 {dimension_numbers = #tpu.dot_dimension_numbers<[2], [2], [1], [1], [0, 0, 0, 1, 1, 1], [0], [0]>} : vector<1x16x8xf32>, vector<1x16x8xf32>, vector<1x16x16xf32> -> vector<1x16x16xf32>
    "tpu.trace_stop"() : () -> ()
    %cst_11 = arith.constant dense<0xFF800000> : vector<1x16xf32>
    %21 = vector.multi_reduction <maximumf>, %20, %cst_11 [2] : vector<1x16x16xf32> to vector<1x16xf32>
    %22 = vector.shape_cast %21 : vector<1x16xf32> to vector<1x16x1xf32>
    %23 = vector.broadcast %22 : vector<1x16x1xf32> to vector<1x16x16xf32>
    %24 = arith.subf %20, %23 : vector<1x16x16xf32>
    %25 = math.exp %24 : vector<1x16x16xf32>
    %cst_12 = arith.constant dense<0.000000e+00> : vector<1x16xf32>
    %26 = vector.multi_reduction <add>, %25, %cst_12 [2] : vector<1x16x16xf32> to vector<1x16xf32>
    %27 = vector.shape_cast %26 : vector<1x16xf32> to vector<1x16x1xf32>
    %28 = tpu.reciprocal %27 : vector<1x16x1xf32> -> vector<1x16x1xf32>
    %29 = vector.broadcast %28 : vector<1x16x1xf32> to vector<1x16x16xf32>
    %30 = arith.mulf %25, %29 : vector<1x16x16xf32>
    "tpu.trace_start"() <{level = 10 : i32, message = "bqk,bkd->bqd"}> : () -> ()
    %cst_13 = arith.constant dense<0.000000e+00> : vector<1x16x8xf32>
    %31 = tpu.matmul %30, %19, %cst_13 {dimension_numbers = #tpu.dot_dimension_numbers<[2], [1], [1], [2], [0, 0, 0, 1, 1, 2], [0], [0]>} : vector<1x16x16xf32>, vector<1x16x8xf32>, vector<1x16x8xf32> -> vector<1x16x8xf32>
    "tpu.trace_stop"() : () -> ()
    %32 = vector.shape_cast %31 : vector<1x16x8xf32> to vector<16x8xf32>
    %33 = vector.extract_strided_slice %11 {offsets = [0, 8], sizes = [16, 8], strides = [1, 1]} : vector<16x32xf32> to vector<16x8xf32>
    %34 = vector.shape_cast %33 : vector<16x8xf32> to vector<1x16x8xf32>
    %35 = vector.extract_strided_slice %12 {offsets = [0, 8], sizes = [16, 8], strides = [1, 1]} : vector<16x32xf32> to vector<16x8xf32>
    %36 = vector.shape_cast %35 : vector<16x8xf32> to vector<1x16x8xf32>
    %37 = vector.extract_strided_slice %13 {offsets = [0, 8], sizes = [16, 8], strides = [1, 1]} : vector<16x32xf32> to vector<16x8xf32>
    %38 = vector.shape_cast %37 : vector<16x8xf32> to vector<1x16x8xf32>
    "tpu.trace_start"() <{level = 10 : i32, message = "bqd,bkd->bqk"}> : () -> ()
    %cst_14 = arith.constant dense<0.000000e+00> : vector<1x16x16xf32>
    %39 = tpu.matmul %34, %36, %cst_14 {dimension_numbers = #tpu.dot_dimension_numbers<[2], [2], [1], [1], [0, 0, 0, 1, 1, 1], [0], [0]>} : vector<1x16x8xf32>, vector<1x16x8xf32>, vector<1x16x16xf32> -> vector<1x16x16xf32>
    "tpu.trace_stop"() : () -> ()
    %cst_15 = arith.constant dense<0xFF800000> : vector<1x16xf32>
    %40 = vector.multi_reduction <maximumf>, %39, %cst_15 [2] : vector<1x16x16xf32> to vector<1x16xf32>
    %41 = vector.shape_cast %40 : vector<1x16xf32> to vector<1x16x1xf32>
    %42 = vector.broadcast %41 : vector<1x16x1xf32> to vector<1x16x16xf32>
    %43 = arith.subf %39, %42 : vector<1x16x16xf32>
    %44 = math.exp %43 : vector<1x16x16xf32>
    %cst_16 = arith.constant dense<0.000000e+00> : vector<1x16xf32>
    %45 = vector.multi_reduction <add>, %44, %cst_16 [2] : vector<1x16x16xf32> to vector<1x16xf32>
    %46 = vector.shape_cast %45 : vector<1x16xf32> to vector<1x16x1xf32>
    %47 = tpu.reciprocal %46 : vector<1x16x1xf32> -> vector<1x16x1xf32>
    %48 = vector.broadcast %47 : vector<1x16x1xf32> to vector<1x16x16xf32>
    %49 = arith.mulf %44, %48 : vector<1x16x16xf32>
    "tpu.trace_start"() <{level = 10 : i32, message = "bqk,bkd->bqd"}> : () -> ()
    %cst_17 = arith.constant dense<0.000000e+00> : vector<1x16x8xf32>
    %50 = tpu.matmul %49, %38, %cst_17 {dimension_numbers = #tpu.dot_dimension_numbers<[2], [1], [1], [2], [0, 0, 0, 1, 1, 2], [0], [0]>} : vector<1x16x16xf32>, vector<1x16x8xf32>, vector<1x16x8xf32> -> vector<1x16x8xf32>
    "tpu.trace_stop"() : () -> ()
    %51 = vector.shape_cast %50 : vector<1x16x8xf32> to vector<16x8xf32>
    %52 = vector.extract_strided_slice %11 {offsets = [0, 16], sizes = [16, 8], strides = [1, 1]} : vector<16x32xf32> to vector<16x8xf32>
    %53 = vector.shape_cast %52 : vector<16x8xf32> to vector<1x16x8xf32>
    %54 = vector.extract_strided_slice %12 {offsets = [0, 16], sizes = [16, 8], strides = [1, 1]} : vector<16x32xf32> to vector<16x8xf32>
    %55 = vector.shape_cast %54 : vector<16x8xf32> to vector<1x16x8xf32>
    %56 = vector.extract_strided_slice %13 {offsets = [0, 16], sizes = [16, 8], strides = [1, 1]} : vector<16x32xf32> to vector<16x8xf32>
    %57 = vector.shape_cast %56 : vector<16x8xf32> to vector<1x16x8xf32>
    "tpu.trace_start"() <{level = 10 : i32, message = "bqd,bkd->bqk"}> : () -> ()
    %cst_18 = arith.constant dense<0.000000e+00> : vector<1x16x16xf32>
    %58 = tpu.matmul %53, %55, %cst_18 {dimension_numbers = #tpu.dot_dimension_numbers<[2], [2], [1], [1], [0, 0, 0, 1, 1, 1], [0], [0]>} : vector<1x16x8xf32>, vector<1x16x8xf32>, vector<1x16x16xf32> -> vector<1x16x16xf32>
    "tpu.trace_stop"() : () -> ()
    %cst_19 = arith.constant dense<0xFF800000> : vector<1x16xf32>
    %59 = vector.multi_reduction <maximumf>, %58, %cst_19 [2] : vector<1x16x16xf32> to vector<1x16xf32>
    %60 = vector.shape_cast %59 : vector<1x16xf32> to vector<1x16x1xf32>
    %61 = vector.broadcast %60 : vector<1x16x1xf32> to vector<1x16x16xf32>
    %62 = arith.subf %58, %61 : vector<1x16x16xf32>
    %63 = math.exp %62 : vector<1x16x16xf32>
    %cst_20 = arith.constant dense<0.000000e+00> : vector<1x16xf32>
    %64 = vector.multi_reduction <add>, %63, %cst_20 [2] : vector<1x16x16xf32> to vector<1x16xf32>
    %65 = vector.shape_cast %64 : vector<1x16xf32> to vector<1x16x1xf32>
    %66 = tpu.reciprocal %65 : vector<1x16x1xf32> -> vector<1x16x1xf32>
    %67 = vector.broadcast %66 : vector<1x16x1xf32> to vector<1x16x16xf32>
    %68 = arith.mulf %63, %67 : vector<1x16x16xf32>
    "tpu.trace_start"() <{level = 10 : i32, message = "bqk,bkd->bqd"}> : () -> ()
    %cst_21 = arith.constant dense<0.000000e+00> : vector<1x16x8xf32>
    %69 = tpu.matmul %68, %57, %cst_21 {dimension_numbers = #tpu.dot_dimension_numbers<[2], [1], [1], [2], [0, 0, 0, 1, 1, 2], [0], [0]>} : vector<1x16x16xf32>, vector<1x16x8xf32>, vector<1x16x8xf32> -> vector<1x16x8xf32>
    "tpu.trace_stop"() : () -> ()
    %70 = vector.shape_cast %69 : vector<1x16x8xf32> to vector<16x8xf32>
    %71 = vector.extract_strided_slice %11 {offsets = [0, 24], sizes = [16, 8], strides = [1, 1]} : vector<16x32xf32> to vector<16x8xf32>
    %72 = vector.shape_cast %71 : vector<16x8xf32> to vector<1x16x8xf32>
    %73 = vector.extract_strided_slice %12 {offsets = [0, 24], sizes = [16, 8], strides = [1, 1]} : vector<16x32xf32> to vector<16x8xf32>
    %74 = vector.shape_cast %73 : vector<16x8xf32> to vector<1x16x8xf32>
    %75 = vector.extract_strided_slice %13 {offsets = [0, 24], sizes = [16, 8], strides = [1, 1]} : vector<16x32xf32> to vector<16x8xf32>
    %76 = vector.shape_cast %75 : vector<16x8xf32> to vector<1x16x8xf32>
    "tpu.trace_start"() <{level = 10 : i32, message = "bqd,bkd->bqk"}> : () -> ()
    %cst_22 = arith.constant dense<0.000000e+00> : vector<1x16x16xf32>
    %77 = tpu.matmul %72, %74, %cst_22 {dimension_numbers = #tpu.dot_dimension_numbers<[2], [2], [1], [1], [0, 0, 0, 1, 1, 1], [0], [0]>} : vector<1x16x8xf32>, vector<1x16x8xf32>, vector<1x16x16xf32> -> vector<1x16x16xf32>
    "tpu.trace_stop"() : () -> ()
    %cst_23 = arith.constant dense<0xFF800000> : vector<1x16xf32>
    %78 = vector.multi_reduction <maximumf>, %77, %cst_23 [2] : vector<1x16x16xf32> to vector<1x16xf32>
    %79 = vector.shape_cast %78 : vector<1x16xf32> to vector<1x16x1xf32>
    %80 = vector.broadcast %79 : vector<1x16x1xf32> to vector<1x16x16xf32>
    %81 = arith.subf %77, %80 : vector<1x16x16xf32>
    %82 = math.exp %81 : vector<1x16x16xf32>
    %cst_24 = arith.constant dense<0.000000e+00> : vector<1x16xf32>
    %83 = vector.multi_reduction <add>, %82, %cst_24 [2] : vector<1x16x16xf32> to vector<1x16xf32>
    %84 = vector.shape_cast %83 : vector<1x16xf32> to vector<1x16x1xf32>
    %85 = tpu.reciprocal %84 : vector<1x16x1xf32> -> vector<1x16x1xf32>
    %86 = vector.broadcast %85 : vector<1x16x1xf32> to vector<1x16x16xf32>
    %87 = arith.mulf %82, %86 : vector<1x16x16xf32>
    "tpu.trace_start"() <{level = 10 : i32, message = "bqk,bkd->bqd"}> : () -> ()
    %cst_25 = arith.constant dense<0.000000e+00> : vector<1x16x8xf32>
    %88 = tpu.matmul %87, %76, %cst_25 {dimension_numbers = #tpu.dot_dimension_numbers<[2], [1], [1], [2], [0, 0, 0, 1, 1, 2], [0], [0]>} : vector<1x16x16xf32>, vector<1x16x8xf32>, vector<1x16x8xf32> -> vector<1x16x8xf32>
    "tpu.trace_stop"() : () -> ()
    %89 = vector.shape_cast %88 : vector<1x16x8xf32> to vector<16x8xf32>
    %90 = tpu.concatenate %32, %51, %70, %89 in 1 : vector<16x8xf32>, vector<16x8xf32>, vector<16x8xf32>, vector<16x8xf32> -> vector<16x32xf32>
    %c0_26 = arith.constant 0 : index
    %c0_27 = arith.constant 0 : index
    %91 = vector.load %arg5[%c0_26, %c0_27] : memref<32x32xf32, #tpu.memory_space<vmem>>, vector<32x32xf32>
    %cst_28 = arith.constant dense<0.000000e+00> : vector<16x32xf32>
    %92 = tpu.matmul %90, %91, %cst_28 {dimension_numbers = #tpu.dot_dimension_numbers<[1], [0], [0], [1], [0, 0, 1, 1], [], []>} : vector<16x32xf32>, vector<32x32xf32>, vector<16x32xf32> -> vector<16x32xf32>
    %c0_29 = arith.constant 0 : index
    %c0_30 = arith.constant 0 : index
    %93 = vector.load %arg6[%c0_29, %c0_30] : memref<1x32xf32, #tpu.memory_space<vmem>>, vector<1x32xf32>
    %94 = vector.broadcast %93 : vector<1x32xf32> to vector<16x32xf32>
    %95 = arith.addf %92, %94 : vector<16x32xf32>
    %c0_31 = arith.constant 0 : index
    %c0_32 = arith.constant 0 : index
    %96 = vector.load %arg7[%c0_31, %c0_32] : memref<32x32xf32, #tpu.memory_space<vmem>>, vector<32x32xf32>
    %cst_33 = arith.constant dense<0.000000e+00> : vector<16x32xf32>
    %97 = tpu.matmul %95, %96, %cst_33 {dimension_numbers = #tpu.dot_dimension_numbers<[1], [0], [0], [1], [0, 0, 1, 1], [], []>} : vector<16x32xf32>, vector<32x32xf32>, vector<16x32xf32> -> vector<16x32xf32>
    %c0_34 = arith.constant 0 : index
    %c0_35 = arith.constant 0 : index
    %98 = vector.load %arg8[%c0_34, %c0_35] : memref<1x32xf32, #tpu.memory_space<vmem>>, vector<1x32xf32>
    %99 = vector.broadcast %98 : vector<1x32xf32> to vector<16x32xf32>
    %100 = arith.addf %97, %99 : vector<16x32xf32>
    %101 = vector.shape_cast %100 : vector<16x32xf32> to vector<1x16x32xf32>
    %c0_36 = arith.constant 0 : index
    %c0_37 = arith.constant 0 : index
    %c0_38 = arith.constant 0 : index
    %102 = vector.load %arg9[%c0_36, %c0_37, %c0_38] : memref<1x16x32xf32, #tpu.memory_space<vmem>>, vector<1x16x32xf32>
    tpu.vector_store %arg9[%c0_36, %c0_37, %c0_38], %101 {strides = array<i32>} : memref<1x16x32xf32, #tpu.memory_space<vmem>>, vector<1x16x32xf32>,
    return
  }
  func.func @transform_0(%arg0: i32) -> (i32, i32, i32) {
    %c0_i32 = arith.constant 0 : i32
    %c0_i32_0 = arith.constant 0 : i32
    %c0_i32_1 = arith.constant 0 : i32
    return %arg0, %c0_i32, %c0_i32_0 : i32, i32, i32
  }
  func.func @transform_1(%arg0: i32) -> (i32, i32, i32) {
    %c0_i32 = arith.constant 0 : i32
    %c0_i32_0 = arith.constant 0 : i32
    %c0_i32_1 = arith.constant 0 : i32
    return %arg0, %c0_i32, %c0_i32_0 : i32, i32, i32
  }
  func.func @transform_2(%arg0: i32) -> (i32, i32) {
    %c0_i32 = arith.constant 0 : i32
    %c0_i32_0 = arith.constant 0 : i32
    %c0_i32_1 = arith.constant 0 : i32
    return %c0_i32, %c0_i32_0 : i32, i32
  }
  func.func @transform_3(%arg0: i32) -> (i32, i32) {
    %c0_i32 = arith.constant 0 : i32
    %c0_i32_0 = arith.constant 0 : i32
    %c0_i32_1 = arith.constant 0 : i32
    return %c0_i32, %c0_i32_0 : i32, i32
  }
  func.func @transform_4(%arg0: i32) -> (i32, i32) {
    %c0_i32 = arith.constant 0 : i32
    %c0_i32_0 = arith.constant 0 : i32
    %c0_i32_1 = arith.constant 0 : i32
    return %c0_i32, %c0_i32_0 : i32, i32
  }
  func.func @transform_5(%arg0: i32) -> (i32, i32) {
    %c0_i32 = arith.constant 0 : i32
    %c0_i32_0 = arith.constant 0 : i32
    %c0_i32_1 = arith.constant 0 : i32
    return %c0_i32, %c0_i32_0 : i32, i32
  }
  func.func @transform_6(%arg0: i32) -> (i32, i32) {
    %c0_i32 = arith.constant 0 : i32
    %c0_i32_0 = arith.constant 0 : i32
    %c0_i32_1 = arith.constant 0 : i32
    return %c0_i32, %c0_i32_0 : i32, i32
  }
  func.func @transform_7(%arg0: i32) -> (i32, i32) {
    %c0_i32 = arith.constant 0 : i32
    %c0_i32_0 = arith.constant 0 : i32
    %c0_i32_1 = arith.constant 0 : i32
    return %c0_i32, %c0_i32_0 : i32, i32
  }
  func.func @transform_8(%arg0: i32) -> (i32, i32, i32) {
    %c0_i32 = arith.constant 0 : i32
    %c0_i32_0 = arith.constant 0 : i32
    %c0_i32_1 = arith.constant 0 : i32
    return %arg0, %c0_i32, %c0_i32_0 : i32, i32, i32
  }
}

</mosaic_0001>

<bundles_post_ra>
// kernel: crosstalk_self_attention.1
= control target key start
LH: loop header
LB: loop body
LE: loop exit
PB: predicated region body
PF: predicated region fallthrough
CT: control target
= control target key end

     0   :  { %s1216_s27 = smov 0   ;;  %s1395_s0 = inlined_call_operand.vmem [shape: f32[2,8,32], index: 0, kind: input, shape index: {}]   ;;  %s1396_s1 = inlined_call_operand.vmem [shape: f32[2,8,32], index: 1, kind: input, shape index: {}]   ;;  %s1397_s2 = inlined_call_operand.vmem [shape: f32[32,96], index: 2, kind: input, shape index: {}]   ;;  %s1398_s3 = inlined_call_operand.vmem [shape: f32[1,96], index: 3, kind: input, shape index: {}]   ;;  %s1399_s4 = inlined_call_operand.vmem [shape: f32[32,32], index: 4, kind: input, shape index: {}]   ;;  %s1400_s5 = inlined_call_operand.vmem [shape: f32[1,32], index: 5, kind: input, shape index: {}]   ;;  %s1401_s6 = inlined_call_operand.vmem [shape: f32[32,32], index: 6, kind: input, shape index: {}]   ;;  %s1402_s7 = inlined_call_operand.vmem [shape: f32[1,32], index: 7, kind: input, shape index: {}]   ;;  %s1403_s8 = inlined_call_operand.vmem [shape: f32[2,16,32], index: 8, kind: output, shape index: {}]  }
   0x1 LB: > { %s1026_s28 = sadd.s32 4294967295, %s1155_s27   ;;  %p1030_p0 = scmp.ge.s32.totalorder %s1155_s27, 1  ;;  %s1155_s27 = sphi %s1216_s27, %s18_s27  }
   0x2   : > { %p270_p1 = scmp.lt.s32.totalorder %s1155_s27, 3 }
   0x4   : > { %p271_p2 = pnand %p1030_p0, %p270_p1 }
   0x5   : > { %p307_p3 = scmp.lt.s32.totalorder (!%p271_p2), %s1026_s28, 1  ;;  %s1157_s24 = smov (!%p271_p2), 120  }
   0x6   : > { %274 = sbr.rel (%p271_p2) target bundleno = 1233 (0x4d1), region = 52  ;;  %s1158_s25 = smov (!%p271_p2), 88  }
   0x7   : > { %s1159_s26 = smov (!%p271_p2), 96   ;;  %s1160_s29 = smov (!%p271_p2), 104  }
   0x8   : > { %s1161_s30 = smov (!%p271_p2), 72   ;;  %s1162_s9 = smov (!%p271_p2), 80  }
   0x9   : > { %s1163_s10 = smov (!%p271_p2), 112   ;;  %s1164_s11 = smov (!%p271_p2), 56  }
   0xa   : > { %s1165_s12 = smov (!%p271_p2), 64   ;;  %s1166_s13 = smov (!%p271_p2), 48  }
   0xb   : > { %v325_v0 = vld [vmem:[%s1397_s2 + $0x18] sm:$0xff]  ;;  %v324_v1 = vld [vmem:[%s1397_s2 + $0x10] sm:$0xff]  ;;  %v323_v2 = vld [vmem:[%s1397_s2 + $0x8] sm:$0xff]  ;;  %s1407_s28 = smov (!%p307_p3, %s1026_s28), 1  ;;  %vm330_vm0 = vcmask 261120   ;;  %vm368_vm1 = vcmask 64512  }
   0xc   : > { %349 = vmatpush.msra.mxu0 %v325_v0  ;;  %1068 = vmatpush.msra.mxu3 %v325_v0  ;;  %v322_v3 = vld [vmem:[%s1397_s2] sm:$0xff]  ;;  %s1031_s15 = sshll.u32 %s1407_s28, 3  ;;  %vm402_vm2 = vcmask 130048   ;;  %s1167_s14 = smov 40  }
   0xd   : > { %s310_s18 = scalar_lea.vmem %s1395_s0, %s1031_s15  ;;  %s314_s21 = scalar_lea.vmem %s1396_s1, %s1031_s15  ;;  %v1114_v6 = vld [vmem:[%s1398_s3] ss:$0 sm:$0xff] }
   0xe   : > { %350 = vmatpush.msra.mxu0 %v324_v1  ;;  %1069 = vmatpush.msra.mxu3 %v324_v1  ;;  %v320_v4 = vld [vmem:[%s310_s18] sm:$0xff]  ;;  %s1168_s15 = smov 16   ;;  %s1169_s16 = smov 24  }
   0xf   : > { %v321_v5 = vld [vmem:[%s314_s21] sm:$0xff]  ;;  %s1170_s17 = smov 8  }
  0x10   : > { %351 = vmatpush.msra.mxu0 %v323_v2  ;;  %1070 = vmatpush.msra.mxu3 %v323_v2 }
  0x12   : > { %352 = vmatpush.msra.mxu0 %v322_v3  ;;  %1071 = vmatpush.msra.mxu3 %v322_v3 }
  0x13   : > { %1035 = vmatmul.msk.f32.vlgmr.msra.gmra.mxu0 %vm330_vm0, %v320_v4  ;;  %1036 = vmatmul.msk.f32.vlgmr.msra.gmra.mxu3 %vm330_vm0, %v321_v5 }
  0x90   : > { %v354_v7 = vpop.f32.mrf.mxu0 }
  0x91   : > { %v355_v8 = vadd.f32 %v1114_v6, %v354_v7 }
  0x93   : > { %v360_v9 = vmul.f32 0.35355338, %v355_v8 }
  0x95   : > { %486 = vrot.lane.b32.xlu2 %v360_v9, %s1157_s24 }
  0x96   : > { %v357_v10 = vpop.f32.mrf.mxu3 }
  0x97   : > { %v358_v11 = vadd.f32 %v1114_v6, %v357_v10 }
  0x99   : > { %492 = vrot.lane.b32.xlu1 %v358_v11, %s1158_s25  ;;  %366 = vrot.lane.b32.xlu0 %v358_v11, %s1159_s26  ;;  %v1250_v12 = vpack.i.bf16 %v355_v8, %v358_v11  ;;  %v361_v13 = vmul.f32 0.35355338, %v358_v11 }
  0x9d   : > { %488 = vrot.lane.b32.xlu2 %v361_v13, %s1157_s24 }
  0xa1   : > { %490 = vrot.lane.b32.xlu1 %v355_v8, %s1158_s25  ;;  %364 = vrot.lane.b32.xlu0 %v355_v8, %s1159_s26 }
  0xa5   : > { %730 = vrot.lane.b32.xlu2 %v360_v9, %s1160_s29 }
  0xa9   : > { %734 = vrot.lane.b32.xlu1 %v355_v8, %s1161_s30  ;;  %736 = vrot.lane.b32.xlu0 %v358_v11, %s1161_s30 }
  0xad   : > { %732 = vrot.lane.b32.xlu2 %v361_v13, %s1160_s29 }
  0xb1   : > { %612 = vrot.lane.b32.xlu1 %v355_v8, %s1162_s9  ;;  %614 = vrot.lane.b32.xlu0 %v358_v11, %s1162_s9 }
  0xb9   : > { %610 = vrot.lane.b32.xlu1 %v361_v13, %s1163_s10  ;;  %608 = vrot.lane.b32.xlu0 %v360_v9, %s1163_s10 }
  0xef   : > { %v487_v16 = vpop.permute.xlu2 %486 }
  0xf7   : > { %v489_v19 = vpop.permute.xlu2 %488 }
  0xff   : > { %v731_v23 = vpop.permute.xlu2 %730 }
 0x107   : > { %v733_v26 = vpop.permute.xlu2 %732 }
 0x10b   : > { %v493_v14 = vpop.permute.xlu1 %492  ;;  %v367_v15 = vpop.permute.xlu0 %366 }
 0x10c   : > { %1037 = vmatpush.xpose.msk.msra.mxu1 %vm368_vm1, %v367_v15  ;;  %1043 = vmatpush.xpose.msk.msrb.mxu3 %vm368_vm1, %v493_v14 }
 0x113   : > { %v491_v17 = vpop.permute.xlu1 %490  ;;  %v365_v18 = vpop.permute.xlu0 %364 }
 0x114   : > { %1038 = vmatpush.xpose.msk.msra.mxu1 %vm368_vm1, %v365_v18  ;;  %1044 = vmatpush.xpose.msk.msrb.mxu3 %vm368_vm1, %v491_v17 }
 0x117   : > { %1039 = vmatmul.msk.f32.vlgmr.msra.gmra.mxu1 %vm368_vm1, %v360_v9  ;;  %1045 = vmatmul.msk.f32.vlgmr.msrb.gmra.mxu3 %vm368_vm1, %v487_v16 }
 0x11b   : > { %v737_v20 = vpop.permute.xlu0 %736  ;;  %v735_v21 = vpop.permute.xlu1 %734 }
 0x11c   : > { %1055 = vmatpush.xpose.msk.msra.mxu3 %vm368_vm1, %v737_v20 }
 0x11f   : > { %1040 = vmatmul.msk.f32.gmra.mxu1 %vm368_vm1, %v361_v13  ;;  %1046 = vmatmul.msk.f32.gmra.mxu3 %vm368_vm1, %v489_v19 }
 0x120   : > { %1056 = vmatpush.xpose.msk.msra.mxu3 %vm368_vm1, %v735_v21 }
 0x123   : > { %v615_v22 = vpop.permute.xlu0 %614  ;;  %v613_v24 = vpop.permute.xlu1 %612 }
 0x124   : > { %1049 = vmatpush.xpose.msk.msrb.mxu0 %vm368_vm1, %v615_v22 }
 0x127   : > { %1057 = vmatmul.msk.f32.vlgmr.msra.gmra.mxu3 %vm368_vm1, %v731_v23 }
 0x128   : > { %1050 = vmatpush.xpose.msk.msrb.mxu0 %vm368_vm1, %v613_v24 }
 0x12b   : > { %v609_v25 = vpop.permute.xlu0 %608  ;;  %v611_v27 = vpop.permute.xlu1 %610 }
 0x12c   : > { %1051 = vmatmul.msk.f32.vlgmr.msrb.gmra.mxu0 %vm368_vm1, %v609_v25 }
 0x12f   : > { %1058 = vmatmul.msk.f32.gmra.mxu3 %vm368_vm1, %v733_v26 }
 0x134   : > { %1052 = vmatmul.msk.f32.gmra.mxu0 %vm368_vm1, %v611_v27 }
 0x194   : > { %v396_v28 = vpop.f32.mrf.mxu1 }
 0x195   : > { %v403_v29 = vsel %vm402_vm2, %v396_v28, -inf }
 0x196   : > { %404 = vmax.xlane.f32.xlu2 %v403_v29 }
 0x19a   : > { %v519_v30 = vpop.f32.mrf.mxu3 }
 0x19b   : > { %v525_v31 = vsel %vm402_vm2, %v519_v30, -inf }
 0x19c   : > { %526 = vmax.xlane.f32.xlu1 %v525_v31  ;;  %v399_v32 = vpop.f32.mrf.mxu1 }
 0x19d   : > { %v406_v33 = vsel %vm402_vm2, %v399_v32, -inf }
 0x19e   : > { %407 = vmax.xlane.f32.xlu0 %v406_v33 }
 0x1a2   : > { %v522_v34 = vpop.f32.mrf.mxu3 }
 0x1a3   : > { %v528_v42 = vsel %vm402_vm2, %v522_v34, -inf }
 0x1a9   : > { %v641_v35 = vpop.f32.mrf.mxu0 }
 0x1aa   : > { %v763_v36 = vpop.f32.mrf.mxu3  ;;  %v647_v37 = vsel %vm402_vm2, %v641_v35, -inf }
 0x1ab   : > { %648 = vmax.xlane.f32.xlu0 %v647_v37  ;;  %v769_v43 = vsel %vm402_vm2, %v763_v36, -inf }
 0x1b1   : > { %v644_v38 = vpop.f32.mrf.mxu0 }
 0x1b2   : > { %v766_v39 = vpop.f32.mrf.mxu3  ;;  %v650_v40 = vsel %vm402_vm2, %v644_v38, -inf }
 0x1b3   : > { %651 = vmax.xlane.f32.xlu2 %v650_v40  ;;  %v772_v41 = vsel %vm402_vm2, %v766_v39, -inf }
 0x1b4   : > { %773 = vmax.xlane.f32.xlu1 %v772_v41 }
 0x1bb   : > { %529 = vmax.xlane.f32.xlu2 %v528_v42 }
 0x1c3   : > { %770 = vmax.xlane.f32.xlu2 %v769_v43 }
 0x1cd   : > { %1100 = vrot.lane.b32.xlu1 %v1250_v12, %s1164_s11 }
 0x209   : > { %v405_v44 = vpop.xlane.xlu2 %404 }
 0x20a   : > { %v409_v45 = vsub.f32 %v396_v28, %v405_v44 }
 0x20c   : > { %v411_v46 = vmul.f32 1.442695, %v409_v45 }
 0x20e   : > { %1117 = vpow2.f32 %v411_v46 }
 0x20f   : > { %v527_v54 = vpop.xlane.xlu1 %526 }
 0x210   : > { %v531_v57 = vsub.f32 %v519_v30, %v527_v54 }
 0x211   : > { %v408_v47 = vpop.xlane.xlu0 %407 }
 0x212   : > { %v410_v48 = vsub.f32 %v399_v32, %v408_v47  ;;  %v533_v59 = vmul.f32 1.442695, %v531_v57 }
 0x214   : > { %v1277_v49 = vpop.eup %1117  ;;  %v413_v50 = vmul.f32 1.442695, %v410_v48 }
 0x215   : > { %v415_v51 = vsel %vm402_vm2, %v1277_v49, 0.0 }
 0x216   : > { %1119 = vpow2.f32 %v413_v50  ;;  %416 = vadd.xlane.f32.xlu0 %v415_v51 }
 0x21c   : > { %v1281_v52 = vpop.eup %1119 }
 0x21d   : > { %v418_v53 = vsel %vm402_vm2, %v1281_v52, 0.0 }
 0x21e   : > { %419 = vadd.xlane.f32.xlu1 %v418_v53  ;;  %v649_v55 = vpop.xlane.xlu0 %648 }
 0x21f   : > { %v653_v56 = vsub.f32 %v641_v35, %v649_v55 }
 0x221   : > { %v655_v58 = vmul.f32 1.442695, %v653_v56 }
 0x223   : > { %1121 = vpow2.f32 %v655_v58 }
 0x224   : > { %1123 = vpow2.f32 %v533_v59 }
 0x226   : > { %v652_v60 = vpop.xlane.xlu2 %651 }
 0x227   : > { %v654_v7 = vsub.f32 %v644_v38, %v652_v60  ;;  %v774_v11 = vpop.xlane.xlu1 %773 }
 0x228   : > { %v776_v14 = vsub.f32 %v766_v39, %v774_v11 }
 0x229   : > { %v1285_v61 = vpop.eup %1121  ;;  %v657_v10 = vmul.f32 1.442695, %v654_v7 }
 0x22a   : > { %1095 = vrot.lane.b32.xlu0 %v1250_v12, %s1165_s12  ;;  %v659_v62 = vsel %vm402_vm2, %v1285_v61, 0.0  ;;  %v1290_v0 = vpop.eup %1123  ;;  %v779_v16 = vmul.f32 1.442695, %v776_v14 }
 0x22b   : > { %660 = vadd.xlane.f32.xlu2 %v659_v62  ;;  %v537_v3 = vsel %vm402_vm2, %v1290_v0, 0.0 }
 0x22e   : > { %v530_v63 = vpop.xlane.xlu2 %529 }
 0x22f   : > { %v532_v1 = vsub.f32 %v522_v34, %v530_v63 }
 0x231   : > { %v535_v2 = vmul.f32 1.442695, %v532_v1 }
 0x233   : > { %1125 = vpow2.f32 %v535_v2  ;;  %538 = vadd.xlane.f32.xlu2 %v537_v3 }
 0x236   : > { %v771_v4 = vpop.xlane.xlu2 %770 }
 0x237   : > { %v775_v5 = vsub.f32 %v763_v36, %v771_v4 }
 0x239   : > { %v1294_v6 = vpop.eup %1125  ;;  %v777_v8 = vmul.f32 1.442695, %v775_v5 }
 0x23a   : > { %v540_v9 = vsel %vm402_vm2, %v1294_v6, 0.0 }
 0x23b   : > { %1127 = vpow2.f32 %v777_v8  ;;  %541 = vadd.xlane.f32.xlu1 %v540_v9 }
 0x23c   : > { %1129 = vpow2.f32 %v657_v10 }
 0x23d   : > { %1131 = vpow2.f32 %v779_v16 }
 0x23f   : > { %v1101_v21 = vpop.permute.xlu1 %1100 }
 0x240   : > { %v1102_v45 = vunpack.i.l.bf16 %v1101_v21  ;;  %v1103_v48 = vunpack.i.h.bf16 %v1101_v21 }
 0x241   : > { %v1298_v13 = vpop.eup %1127 }
 0x242   : > { %v781_v15 = vsel %vm402_vm2, %v1298_v13, 0.0  ;;  %v1302_v17 = vpop.eup %1129 }
 0x243   : > { %782 = vadd.xlane.f32.xlu2 %v781_v15  ;;  %v662_v18 = vsel %vm402_vm2, %v1302_v17, 0.0  ;;  %v1306_v19 = vpop.eup %1131 }
 0x244   : > { %v784_v20 = vsel %vm402_vm2, %v1306_v19, 0.0 }
 0x24b   : > { %663 = vadd.xlane.f32.xlu2 %v662_v18 }
 0x254   : > { %785 = vadd.xlane.f32.xlu0 %v784_v20  ;;  %1110 = vrot.lane.b32.xlu1 %v1250_v12, %s1166_s13 }
 0x263   : > { %1105 = vrot.lane.b32.xlu2 %v1250_v12, %s1167_s14 }
 0x289   : > { %v417_v22 = vpop.xlane.xlu0 %416 }
 0x28a   : > { %1133 = vrcp.f32 %v417_v22  ;;  %v432_v28 = vand.u32 2147483648, %v417_v22  ;;  %vm426_vm4 = vweird.f32 %v417_v22  ;;  %v430_v31 = vand.u32 2147483647, %v417_v22 }
 0x28c   : > { %v433_v34 = vor.u32 1.1754944e-38, %v432_v28  ;;  %vm431_vm6 = vcmp.eq.f32.partialorder %v430_v31, 8.507059e+37 }
 0x290   : > { %v1134_v23 = vpop.eup %1133 }
 0x291   : > { %v422_v24 = vmul.f32 %v1134_v23, %v417_v22  ;;  %v420_v25 = vpop.xlane.xlu1 %419  ;;  %vm427_vm3 = vweird.f32 %v1134_v23 }
 0x292   : > { %1135 = vrcp.f32 %v420_v25  ;;  %vm428_vm5 = vmor %vm426_vm4, %vm427_vm3  ;;  %v446_v40 = vand.u32 2147483648, %v420_v25  ;;  %vm440_vm8 = vweird.f32 %v420_v25  ;;  %v444_v44 = vand.u32 2147483647, %v420_v25 }
 0x293   : > { %v423_v26 = vsub.f32 1.0, %v422_v24 }
 0x294   : > { %v447_v47 = vor.u32 1.1754944e-38, %v446_v40  ;;  %vm445_vm10 = vcmp.eq.f32.partialorder %v444_v44, 8.507059e+37 }
 0x295   : > { %v424_v27 = vmul.f32 %v1134_v23, %v423_v26 }
 0x297   : > { %v425_v29 = vadd.f32 %v1134_v23, %v424_v27 }
 0x298   : > { %v1136_v30 = vpop.eup %1135 }
 0x299   : > { %v436_v32 = vmul.f32 %v1136_v30, %v420_v25  ;;  %v429_v33 = vsel %vm428_vm5, %v1134_v23, %v425_v29  ;;  %vm441_vm7 = vweird.f32 %v1136_v30 }
 0x29a   : > { %v434_v38 = vsel %vm431_vm6, %v433_v34, %v429_v33  ;;  %vm442_vm9 = vmor %vm440_vm8, %vm441_vm7 }
 0x29b   : > { %v437_v12 = vsub.f32 1.0, %v436_v32  ;;  %v449_v42 = vmul.f32 %v1277_v49, %v434_v38 }
 0x29c   : > { %v1096_v35 = vpop.permute.xlu0 %1095 }
 0x29d   : > { %v438_v36 = vmul.f32 %v1136_v30, %v437_v12  ;;  %v1097_v37 = vunpack.i.l.bf16 %v1096_v35  ;;  %v1098_v41 = vunpack.i.h.bf16 %v1096_v35 }
 0x29e   : > { %v1312_v39 = vpop.xlane.xlu2 %660 }
 0x29f   : > { %477 = vmatpush.msra.mxu2 %v1097_v37  ;;  %v439_v43 = vadd.f32 %v1136_v30, %v438_v36  ;;  %v676_v25 = vand.u32 2147483648, %v1312_v39  ;;  %vm670_vm7 = vweird.f32 %v1312_v39  ;;  %v674_v28 = vand.u32 2147483647, %v1312_v39 }
 0x2a1   : > { %478 = vmatpush.msra.mxu2 %v1098_v41  ;;  %v443_v46 = vsel %vm442_vm9, %v1136_v30, %v439_v43  ;;  %v677_v34 = vor.u32 1.1754944e-38, %v676_v25 }
 0x2a2   : > { %1041 = vmatmul.msk.f32.vlgmr.msra.gmra.mxu2 %vm402_vm2, %v449_v42  ;;  %v448_v50 = vsel %vm445_vm10, %v447_v47, %v443_v46 }
 0x2a3   : > { %599 = vmatpush.msrb.mxu2 %v1102_v45  ;;  %v450_v53 = vmul.f32 %v1281_v52, %v448_v50 }
 0x2a5   : > { %600 = vmatpush.msrb.mxu2 %v1103_v48 }
 0x2a6   : > { %v539_v51 = vpop.xlane.xlu2 %538 }
 0x2a7   : > { %1137 = vrcp.f32 %v539_v51  ;;  %v554_v59 = vand.u32 2147483648, %v539_v51  ;;  %v552_v62 = vand.u32 2147483647, %v539_v51  ;;  %vm548_vm12 = vweird.f32 %v539_v51 }
 0x2a8   : > { %1139 = vrcp.f32 %v1312_v39 }
 0x2a9   : > { %v555_v1 = vor.u32 1.1754944e-38, %v554_v59  ;;  %vm553_vm14 = vcmp.eq.f32.partialorder %v552_v62, 8.507059e+37 }
 0x2aa   : > { %1042 = vmatmul.msk.f32.gmra.mxu2 %vm402_vm2, %v450_v53 }
 0x2ad   : > { %v1138_v49 = vpop.eup %1137 }
 0x2ae   : > { %v544_v54 = vmul.f32 %v1138_v49, %v539_v51  ;;  %v542_v55 = vpop.xlane.xlu1 %541  ;;  %v1319_v56 = vpop.eup %1139  ;;  %vm549_vm11 = vweird.f32 %v1138_v49 }
 0x2af   : > { %1141 = vrcp.f32 %v542_v55  ;;  %v666_v60 = vmul.f32 %v1319_v56, %v1312_v39  ;;  %vm550_vm13 = vmor %vm548_vm12, %vm549_vm11  ;;  %v568_v9 = vand.u32 2147483648, %v542_v55  ;;  %v566_v14 = vand.u32 2147483647, %v542_v55 }
 0x2b0   : > { %v545_v57 = vsub.f32 1.0, %v544_v54  ;;  %vm562_vm3 = vweird.f32 %v542_v55  ;;  %vm671_vm6 = vweird.f32 %v1319_v56  ;;  %vm675_vm11 = vcmp.eq.f32.partialorder %v674_v28, 8.507059e+37 }
 0x2b1   : > { %v667_v5 = vsub.f32 1.0, %v666_v60  ;;  %v569_v20 = vor.u32 1.1754944e-38, %v568_v9  ;;  %vm567_vm5 = vcmp.eq.f32.partialorder %v566_v14, 8.507059e+37  ;;  %vm1332_vm8 = vmor %vm670_vm7, %vm671_vm6 }
 0x2b2   : > { %v546_v58 = vmul.f32 %v1138_v49, %v545_v57 }
 0x2b3   : > { %v668_v15 = vmul.f32 %v1319_v56, %v667_v5 }
 0x2b4   : > { %v547_v63 = vadd.f32 %v1138_v49, %v546_v58 }
 0x2b5   : > { %v1142_v52 = vpop.eup %1141  ;;  %v669_v24 = vadd.f32 %v1319_v56, %v668_v15  ;;  %v885_v15 = vld [vmem:[%s1399_s4 + $0x10] sm:$0xff] }
 0x2b6   : > { %v558_v2 = vmul.f32 %v1142_v52, %v542_v55  ;;  %v783_v3 = vpop.xlane.xlu2 %782  ;;  %v551_v4 = vsel %vm550_vm13, %v1138_v49, %v547_v63  ;;  %vm563_vm15 = vweird.f32 %v1142_v52 }
 0x2b7   : > { %1143 = vrcp.f32 %v783_v3  ;;  %v556_v8 = vsel %vm553_vm14, %v555_v1, %v551_v4  ;;  %vm564_vm4 = vmor %vm562_vm3, %vm563_vm15  ;;  %v798_v29 = vand.u32 2147483648, %v783_v3  ;;  %v796_v32 = vand.u32 2147483647, %v783_v3 }
 0x2b8   : > { %v559_v7 = vsub.f32 1.0, %v558_v2  ;;  %v571_v10 = vmul.f32 %v1290_v0, %v556_v8  ;;  %v673_v33 = vsel %vm1332_vm8, %v1319_v56, %v669_v24  ;;  %vm792_vm10 = vweird.f32 %v783_v3 }
 0x2b9   : > { %v799_v35 = vor.u32 1.1754944e-38, %v798_v29  ;;  %vm797_vm13 = vcmp.eq.f32.partialorder %v796_v32, 8.507059e+37  ;;  %v678_v40 = vsel %vm675_vm11, %v677_v34, %v673_v33  ;;  %v921_v33 = vld [vmem:[%s1401_s6 + $0x8] sm:$0xff]  ;;  %v920_v34 = vld [vmem:[%s1401_s6] sm:$0xff] }
 0x2ba   : > { %v560_v11 = vmul.f32 %v1142_v52, %v559_v7  ;;  %1047 = vmatmul.msk.f32.vlgmr.msrb.gmra.mxu2 %vm402_vm2, %v571_v10  ;;  %v693_v50 = vmul.f32 %v1285_v61, %v678_v40 }
 0x2bc   : > { %v561_v16 = vadd.f32 %v1142_v52, %v560_v11 }
 0x2bd   : > { %v1144_v18 = vpop.eup %1143 }
 0x2be   : > { %v788_v21 = vmul.f32 %v1144_v18, %v783_v3  ;;  %v664_v22 = vpop.xlane.xlu2 %663  ;;  %v565_v23 = vsel %vm564_vm4, %v1142_v52, %v561_v16  ;;  %vm793_vm9 = vweird.f32 %v1144_v18  ;;  %v884_v16 = vld [vmem:[%s1399_s4 + $0x8] sm:$0xff] }
 0x2bf   : > { %1145 = vrcp.f32 %v664_v22  ;;  %v570_v0 = vsel %vm567_vm5, %v569_v20, %v565_v23  ;;  %vm794_vm12 = vmor %vm792_vm10, %vm793_vm9  ;;  %v690_v46 = vand.u32 2147483648, %v664_v22  ;;  %v688_v49 = vand.u32 2147483647, %v664_v22  ;;  %v923_v20 = vld [vmem:[%s1401_s6 + $0x18] sm:$0xff] }
 0x2c0   : > { %v789_v26 = vsub.f32 1.0, %v788_v21  ;;  %v572_v27 = vmul.f32 %v1294_v6, %v570_v0  ;;  %vm684_vm15 = vweird.f32 %v664_v22  ;;  %v922_v21 = vld [vmem:[%s1401_s6 + $0x10] sm:$0xff]  ;;  %vm880_vm9 = vcmask 195584  }
 0x2c1   : > { %v691_v55 = vor.u32 1.1754944e-38, %v690_v46  ;;  %vm689_vm4 = vcmp.eq.f32.partialorder %v688_v49, 8.507059e+37 }
 0x2c2   : > { %v790_v31 = vmul.f32 %v1144_v18, %v789_v26  ;;  %1048 = vmatmul.msk.f32.gmra.mxu2 %vm402_vm2, %v572_v27 }
 0x2c4   : > { %v791_v6 = vadd.f32 %v1144_v18, %v790_v31 }
 0x2c5   : > { %v1146_v12 = vpop.eup %1145 }
 0x2c6   : > { %v795_v36 = vsel %vm794_vm12, %v1144_v18, %v791_v6  ;;  %v680_v37 = vmul.f32 %v1146_v12, %v664_v22  ;;  %v1111_v38 = vpop.permute.xlu1 %1110  ;;  %v1106_v39 = vpop.permute.xlu2 %1105  ;;  %vm685_vm14 = vweird.f32 %v1146_v12  ;;  %v883_v18 = vld [vmem:[%s1399_s4] sm:$0xff] }
 0x2c7   : > { %v800_v41 = vsel %vm797_vm13, %v799_v35, %v795_v36  ;;  %v1107_v42 = vunpack.i.l.bf16 %v1106_v39  ;;  %v786_v43 = vpop.xlane.xlu0 %785  ;;  %v1112_v44 = vunpack.i.l.bf16 %v1111_v38  ;;  %v1108_v47 = vunpack.i.h.bf16 %v1106_v39  ;;  %vm686_vm3 = vmor %vm684_vm15, %vm685_vm14  ;;  %v1115_v6 = vld [vmem:[%s1400_s5] ss:$0 sm:$0xff] }
 0x2c8   : > { %v681_v45 = vsub.f32 1.0, %v680_v37  ;;  %1147 = vrcp.f32 %v786_v43  ;;  %v1113_v48 = vunpack.i.h.bf16 %v1111_v38  ;;  %v815_v53 = vmul.f32 %v1298_v13, %v800_v41  ;;  %v1116_v38 = vld [vmem:[%s1402_s7] ss:$0 sm:$0xff] }
 0x2c9   : > { %721 = vmatpush.msrb.mxu1 %v1112_v44  ;;  %843 = vmatpush.msra.mxu2 %v1107_v42  ;;  %v812_v60 = vand.u32 2147483648, %v786_v43  ;;  %v810_v63 = vand.u32 2147483647, %v786_v43  ;;  %vm806_vm6 = vweird.f32 %v786_v43 }
 0x2ca   : > { %v682_v51 = vmul.f32 %v1146_v12, %v681_v45 }
 0x2cb   : > { %722 = vmatpush.msrb.mxu1 %v1113_v48  ;;  %844 = vmatpush.msra.mxu2 %v1108_v47  ;;  %v813_v1 = vor.u32 1.1754944e-38, %v812_v60  ;;  %vm811_vm8 = vcmp.eq.f32.partialorder %v810_v63, 8.507059e+37 }
 0x2cc   : > { %1053 = vmatmul.msk.f32.vlgmr.msrb.gmra.mxu1 %vm402_vm2, %v693_v50  ;;  %1059 = vmatmul.msk.f32.vlgmr.msra.gmra.mxu2 %vm402_vm2, %v815_v53  ;;  %v683_v54 = vadd.f32 %v1146_v12, %v682_v51 }
 0x2cd   : > { %946 = vmatpush.msra.mxu1 %v923_v20 }
 0x2ce   : > { %v1148_v56 = vpop.eup %1147  ;;  %v687_v57 = vsel %vm686_vm3, %v1146_v12, %v683_v54 }
 0x2cf   : > { %v802_v58 = vmul.f32 %v1148_v56, %v786_v43  ;;  %v692_v61 = vsel %vm689_vm4, %v691_v55, %v687_v57  ;;  %vm807_vm5 = vweird.f32 %v1148_v56  ;;  %947 = vmatpush.msra.mxu1 %v922_v21 }
 0x2d0   : > { %v694_v13 = vmul.f32 %v1302_v17, %v692_v61  ;;  %vm808_vm7 = vmor %vm806_vm6, %vm807_vm5 }
 0x2d1   : > { %v803_v59 = vsub.f32 1.0, %v802_v58  ;;  %948 = vmatpush.msra.mxu1 %v921_v33 }
 0x2d3   : > { %v804_v62 = vmul.f32 %v1148_v56, %v803_v59  ;;  %949 = vmatpush.msra.mxu1 %v920_v34 }
 0x2d4   : > { %1054 = vmatmul.msk.f32.gmra.mxu1 %vm402_vm2, %v694_v13 }
 0x2d5   : > { %v805_v52 = vadd.f32 %v1148_v56, %v804_v62 }
 0x2d7   : > { %v809_v2 = vsel %vm808_vm7, %v1148_v56, %v805_v52 }
 0x2d8   : > { %v814_v3 = vsel %vm811_vm8, %v813_v1, %v809_v2 }
 0x2d9   : > { %v816_v4 = vmul.f32 %v1306_v19, %v814_v3  ;;  %v886_v19 = vld [vmem:[%s1399_s4 + $0x18] sm:$0xff] }
 0x2da   : > { %909 = vmatpush.msra.mxu0 %v886_v19 }
 0x2db   : > { %1060 = vmatmul.msk.f32.gmra.mxu2 %vm402_vm2, %v816_v4 }
 0x2dc   : > { %910 = vmatpush.msra.mxu0 %v885_v15 }
 0x2de   : > { %911 = vmatpush.msra.mxu0 %v884_v16 }
 0x2e0   : > { %912 = vmatpush.msra.mxu0 %v883_v18 }
 0x325   : > { %v480_v5 = vpop.f32.mrf.mxu2 }
 0x32d   : > { %v483_v7 = vpop.f32.mrf.mxu2 }
 0x33d   : > { %v602_v8 = vpop.f32.mrf.mxu2 }
 0x345   : > { %v605_v17 = vpop.f32.mrf.mxu2 }
 0x349   : > { %v724_v9 = vpop.f32.mrf.mxu1 }
 0x34a   : > { %862 = vrot.lane.b32.xlu1 %v724_v9, %s1168_s15 }
 0x34f   : > { %v846_v10 = vpop.f32.mrf.mxu2 }
 0x350   : > { %870 = vrot.lane.b32.xlu2 %v846_v10, %s1169_s16 }
 0x351   : > { %v727_v11 = vpop.f32.mrf.mxu1 }
 0x352   : > { %864 = vrot.lane.b32.xlu0 %v727_v11, %s1168_s15  ;;  %854 = vrot.lane.b32.xlu1 %v602_v8, %s1170_s17 }
 0x35a   : > { %856 = vrot.lane.b32.xlu1 %v605_v17, %s1170_s17 }
 0x35e   : > { %v849_v14 = vpop.f32.mrf.mxu2 }
 0x35f   : > { %872 = vrot.lane.b32.xlu2 %v849_v14, %s1169_s16  ;;  %s1067_s16 = sshll.u32 %s1407_s28, 4 }
 0x360   : > { %s319_s21 = scalar_lea.vmem %s1403_s8, %s1067_s16 }
 0x3aa   : > { %v871_v0 = vpop.permute.xlu2 %870 }
 0x3b9   : > { %v873_v30 = vpop.permute.xlu2 %872 }
 0x3bc   : > { %v863_v22 = vpop.permute.xlu1 %862 }
 0x3c4   : > { %v855_v23 = vpop.permute.xlu1 %854  ;;  %v865_v28 = vpop.permute.xlu0 %864 }
 0x3c5   : > { %v876_v24 = vsel %vm368_vm1, %v480_v5, %v855_v23 }
 0x3c6   : > { %v878_v25 = vsel %vm402_vm2, %v876_v24, %v863_v22 }
 0x3c7   : > { %v881_v26 = vsel %vm880_vm9, %v878_v25, %v871_v0 }
 0x3c8   : > { %1061 = vmatmul.msk.f32.vlgmr.msra.gmra.mxu0 %vm330_vm0, %v881_v26 }
 0x3cc   : > { %v857_v27 = vpop.permute.xlu1 %856 }
 0x3cd   : > { %v877_v29 = vsel %vm368_vm1, %v483_v7, %v857_v27 }
 0x3ce   : > { %v879_v31 = vsel %vm402_vm2, %v877_v29, %v865_v28 }
 0x3cf   : > { %v882_v32 = vsel %vm880_vm9, %v879_v31, %v873_v30 }
 0x3d0   : > { %1062 = vmatmul.msk.f32.gmra.mxu0 %vm330_vm0, %v882_v32 }
 0x445   : > { %v914_v12 = vpop.f32.mrf.mxu0 }
 0x446   : > { %v915_v35 = vadd.f32 %v1115_v6, %v914_v12 }
 0x448   : > { %1063 = vmatmul.msk.f32.vlgmr.msra.gmra.mxu1 %vm330_vm0, %v915_v35 }
 0x44d   : > { %v917_v36 = vpop.f32.mrf.mxu0 }
 0x44e   : > { %v918_v37 = vadd.f32 %v1115_v6, %v917_v36 }
 0x450   : > { %1064 = vmatmul.msk.f32.gmra.mxu1 %vm330_vm0, %v918_v37 }
 0x4c5   : > { %v951_v39 = vpop.f32.mrf.mxu1 }
 0x4c6   : > { %v952_v40 = vadd.f32 %v1116_v38, %v951_v39 }
 0x4c8   : > { %957 = vst.msk [vmem:[%s319_s21] sm:$0xff] %vm330_vm0, %v952_v40 }
 0x4cd   : > { %v954_v41 = vpop.f32.mrf.mxu1 }
 0x4ce   : > { %v955_v42 = vadd.f32 %v1116_v38, %v954_v41 }
 0x4d0   : > { %958 = vst.msk [vmem:[%s319_s21 + $0x8] sm:$0xff] %vm330_vm0, %v955_v42 }
 0x4d1 PF: > { %s18_s27 = sadd.s32 1, %s1155_s27  }
 0x4d2   : > { %p15_p4 = scmp.ge.s32.totalorder %s18_s27, 4  }
 0x4d4   :  { %17 = sbr.rel (!%p15_p4) target bundleno = 1 (0x1), region = 85 }

</bundles_post_ra>
